<compile_context>
chip_gen: v6e
topology: v6e:2x2x1
jax: 0.10.0
libtpu: 0.0.40
codegen_flags: <defaults>
</compile_context>

<pallas_src>
import functools

import jax
import jax.numpy as jnp
from jax.experimental import pallas as pl
from jax.experimental.pallas import tpu as pltpu

H1, H2 = 64, 32        # true hidden widths (PyTorch module)
H1P, H2P = 128, 128    # lane-padded widths used inside the kernel


def mlp_kernel(x_ref, w1_ref, b1_ref, w2_ref, b2_ref, w3_ref, b3_ref, o_ref):
    """Fused Linear->ReLU->Linear->ReLU->Linear for one batch tile.

    x_ref : (block_m, D)   native input dtype (f32 stream; cast to bf16 in-kernel)
    w1_ref: (D, 128)  bf16     b1_ref: (1, 128)  elementwise dtype
    w2_ref: (128,128) bf16     b2_ref: (1, 128)  elementwise dtype
    w3_ref: (128, 1)  bf16     b3_ref: (1, 1)    f32
    o_ref : (block_m, 1) f32
    """
    cdt = w1_ref.dtype    # MXU operand dtype (bf16)
    ew = b1_ref.dtype     # elementwise dtype: bf16 on v6e/v7x, f32 on v5e/older

    # Cheap in-kernel VPU cast keeps the HBM x stream at its native width (no wrapper astype).
    x = x_ref[...].astype(cdt)

    h1 = jnp.dot(x, w1_ref[...], preferred_element_type=jnp.float32)
    h1 = jnp.maximum(h1.astype(ew) + b1_ref[...], 0).astype(cdt)

    h2 = jnp.dot(h1, w2_ref[...], preferred_element_type=jnp.float32)
    h2 = jnp.maximum(h2.astype(ew) + b2_ref[...], 0).astype(cdt)

    # Plain NN form: (block_m, 128) @ (128, 1) -> (block_m, 1); no transpose of h2 needed.
    y = jnp.dot(h2, w3_ref[...], preferred_element_type=jnp.float32)
    o_ref[...] = (y + b3_ref[...]).astype(o_ref.dtype)


def _tpu_config():
    """(two_tensorcores, vmem_limit_bytes, elementwise_dtype) for the attached TPU generation."""
    kind = ""
    try:
        kind = jax.devices()[0].device_kind.lower()
    except Exception:
        pass
    two_tc = "v7" in kind                           # v7x: 2 TensorCores / chip
    bf16_valu = ("v6" in kind) or ("v7" in kind)    # bf16-native VPU on v6e/v7x only
    if two_tc:
        vmem_limit = 48 * 1024 * 1024               # v7x: 64 MiB physical -> leave headroom
    else:
        vmem_limit = 64 * 1024 * 1024               # v5e/v6e: 128 MiB physical
    ew_dtype = jnp.bfloat16 if bf16_valu else jnp.float32
    return two_tc, vmem_limit, ew_dtype


def _pick_block_m(batch, d, x_itemsize, *, vmem_limit_bytes, two_tc):
    """Largest 128-multiple batch tile whose per-step VMEM footprint (double-buffered x tile +
    double-buffered (block_m,1) output + (block_m,128) h1/h2 temporaries + weight buffers)
    stays within ~70% of the scoped VMEM limit.  Clamped to [128, 4096]."""
    per_row = 2 * d * x_itemsize + 2 * 4 + 2560     # x dbuf + out dbuf + intermediates/bf16 casts
    weights = 2 * ((d * H1P + H1P * H2P + H2P) * 2 + (H1P + H2P) * 4 + 64)
    budget = int(0.7 * vmem_limit_bytes) - weights
    bm = max(128, min(4096, (budget // per_row) // 128 * 128))
    b_pad = 128 * pl.cdiv(batch, 128)
    bm = min(bm, b_pad)                             # never tile past the (padded) batch
    # Split into >=2 grid steps only on 2-TC chips (v7x), and only when each half still has
    # >=512 rows to amortize the ~0.35 us/step overhead.  v5e/v6e are single-TC: one big tile.
    if two_tc and b_pad >= 1024 and b_pad // bm < 2:
        bm = max(512, 128 * ((b_pad // 2 + 127) // 128))
    return bm


def _weight_spec(shape, single_buffer):
    """Grid-invariant (index always (0,...)) weight/bias spec; single-buffered if supported."""
    idx = lambda i, _nd=len(shape): (0,) * _nd
    if single_buffer:
        try:
            return pl.BlockSpec(shape, idx, pipeline_mode=pl.Buffered(buffer_count=1))
        except TypeError:
            pass
    return pl.BlockSpec(shape, idx)


@functools.lru_cache(maxsize=None)
def _build_mlp_call(b_pad, d, block_m, x_dtype_str, ew_dtype_str, vmem_limit, single_buffer):
    x_dt = jnp.dtype(x_dtype_str)
    ew_dt = jnp.dtype(ew_dtype_str)
    grid = (b_pad // block_m,)

    flops = 2 * b_pad * (d * H1P + H1P * H2P + H2P)
    bytes_accessed = (b_pad * d * x_dt.itemsize + b_pad * 4
                      + (d * H1P + H1P * H2P + H2P) * 2
                      + (H1P + H2P) * ew_dt.itemsize + 4)

    return pl.pallas_call(
        mlp_kernel,
        out_shape=jax.ShapeDtypeStruct((b_pad, 1), jnp.float32),
        grid_spec=pltpu.PrefetchScalarGridSpec(
            num_scalar_prefetch=0,
            grid=grid,
            in_specs=[
                pl.BlockSpec((block_m, d), lambda i: (i, 0)),     # x tile over the batch axis
                _weight_spec((d, H1P), single_buffer),
                _weight_spec((1, H1P), single_buffer),
                _weight_spec((H1P, H2P), single_buffer),
                _weight_spec((1, H2P), single_buffer),
                _weight_spec((H2P, 1), single_buffer),
                _weight_spec((1, 1), single_buffer),
            ],
            out_specs=pl.BlockSpec((block_m, 1), lambda i: (i, 0)),
        ),
        compiler_params=pltpu.CompilerParams(
            dimension_semantics=("parallel",),
            vmem_limit_bytes=int(vmem_limit),
        ),
        cost_estimate=pl.CostEstimate(flops=int(flops), transcendentals=0,
                                      bytes_accessed=int(bytes_accessed)),
    )


def mlp_forward(x, kernel_params, block_m=None):
    w1, b1, w2, b2, w3, b3 = kernel_params
    B, D = x.shape
    two_tc, vmem_limit, _ = _tpu_config()

    if block_m is None:
        block_m = _pick_block_m(B, D, jnp.dtype(x.dtype).itemsize,
                                vmem_limit_bytes=vmem_limit, two_tc=two_tc)
    assert block_m % 128 == 0, "block_m must be a multiple of 128"

    b_pad = block_m * pl.cdiv(B, block_m)
    if b_pad != B:
        x = jnp.pad(x, ((0, b_pad - B), (0, 0)))    # ragged tail handled by padding + slice

    out, err = None, None
    for single_buffer in (True, False):             # prefer Buffered(1) weights; fall back cleanly
        try:
            fn = _build_mlp_call(int(b_pad), int(D), int(block_m),
                                 str(x.dtype), str(b1.dtype), int(vmem_limit), single_buffer)
            out = fn(x, w1, b1, w2, b2, w3, b3)
            break
        except Exception as e:  # noqa: BLE001 - retry with default double buffering
            err = e
    if out is None:
        raise err
    return out[:B]


def init_params(key, encoded_shape):
    """f32 master params mirroring PyTorch nn.Linear init; weights stored (in, out)."""
    def linear(k, fan_in, fan_out):
        kw, kb = jax.random.split(k)
        bound = 1.0 / float(fan_in) ** 0.5
        w = jax.random.uniform(kw, (fan_in, fan_out), jnp.float32, -bound, bound)
        b = jax.random.uniform(kb, (fan_out,), jnp.float32, -bound, bound)
        return w, b

    k1, k2, k3 = jax.random.split(key, 3)
    w1, b1 = linear(k1, encoded_shape, H1)
    w2, b2 = linear(k2, H1, H2)
    w3, b3 = linear(k3, H2, 1)
    return (w1, b1, w2, b2, w3, b3)


def prepare_kernel_params(params, compute_dtype=jnp.bfloat16, elem_dtype=None):
    """Zero-pad hidden widths to 128 lanes (padded columns stay exactly 0 through bias+ReLU, so
    results are identical), cast weights to the bf16 compute dtype, and store the layer-1/2
    biases in the elementwise dtype (bf16 on v6e/v7x, f32 on v5e/older)."""
    if elem_dtype is None:
        elem_dtype = _tpu_config()[2]
    w1, b1, w2, b2, w3, b3 = params
    d = w1.shape[0]

    def padw(w, rows, cols):
        return jnp.zeros((rows, cols), jnp.float32).at[:w.shape[0], :w.shape[1]].set(w)

    w1p = padw(w1, d, H1P).astype(compute_dtype)
    w2p = padw(w2, H1P, H2P).astype(compute_dtype)
    w3p = padw(w3, H2P, 1).astype(compute_dtype)          # (128, 1) column, plain NN form
    b1p = jnp.zeros((1, H1P), jnp.float32).at[0, :H1].set(b1).astype(elem_dtype)
    b2p = jnp.zeros((1, H2P), jnp.float32).at[0, :H2].set(b2).astype(elem_dtype)
    b3p = b3.reshape(1, 1).astype(jnp.float32)
    return (w1p, b1p, w2p, b2p, w3p, b3p)


def mlp_reference(x, params, compute_dtype=jnp.bfloat16, elem_dtype=jnp.bfloat16):
    """Pure-JAX reference with the same precision path as the kernel."""
    w1, b1, w2, b2, w3, b3 = params
    c = lambda a: a.astype(compute_dtype)
    e = lambda a: a.astype(elem_dtype)
    h1 = jnp.maximum(e(jnp.dot(c(x), c(w1), preferred_element_type=jnp.float32)) + e(b1), 0)
    h2 = jnp.maximum(e(jnp.dot(c(h1), c(w2), preferred_element_type=jnp.float32)) + e(b2), 0)
    return jnp.dot(c(h2), c(w3), preferred_element_type=jnp.float32) + b3.astype(jnp.float32)


if __name__ == "__main__":
    key = jax.random.PRNGKey(0)
    kx, kp = jax.random.split(key)

    batch, encoded_shape = 8, 32
    x = jax.random.normal(kx, (batch, encoded_shape), jnp.float32)
    params = init_params(kp, encoded_shape)

    _, _, ew_dtype = _tpu_config()
    kparams = prepare_kernel_params(params, elem_dtype=ew_dtype)

    out = mlp_forward(x, kparams)
    jax.block_until_ready(out)
    assert out.shape == (batch, 1), out.shape

    # Matched-precision reference (bf16 operands, f32 MXU accumulation, same elementwise dtype).
    ref = mlp_reference(x, params, elem_dtype=ew_dtype)
    assert jnp.allclose(out, ref, atol=1e-2, rtol=1e-2), float(jnp.max(jnp.abs(out - ref)))
    # Full-f32 reference sanity check (loose tolerance covers bf16 rounding).
    ref32 = mlp_reference(x, params, compute_dtype=jnp.float32, elem_dtype=jnp.float32)
    assert jnp.allclose(out, ref32, atol=5e-2, rtol=5e-2)

    print("KERNEL_OK")
</pallas_src>

<mosaic_0001>
module attributes {stable_mosaic.version = 11 : i64} {
  func.func @mlp_kernel(%arg0: i32, %arg1: memref<128x32xf32, #tpu.memory_space<vmem>>, %arg2: memref<32x128xbf16, #tpu.memory_space<vmem>>, %arg3: memref<1x128xf32, #tpu.memory_space<vmem>>, %arg4: memref<128x128xbf16, #tpu.memory_space<vmem>>, %arg5: memref<1x128xf32, #tpu.memory_space<vmem>>, %arg6: memref<128x1xbf16, #tpu.memory_space<vmem>>, %arg7: memref<1x1xf32, #tpu.memory_space<vmem>>, %arg8: memref<128x1xf32, #tpu.memory_space<vmem>>) attributes {dimension_semantics = [#tpu.dimension_semantics<parallel>], iteration_bounds = array<i64: 1>, scalar_prefetch = 0 : i64, scratch_operands = 0 : i64, tpu.core_type = #tpu.core_type<tc>, window_params = [{transform_indices = @transform_0, window_bounds = array<i64: 128, 32>}, {pipeline_mode = #tpu.pipeline_mode<synchronous>, transform_indices = @transform_1, window_bounds = array<i64: 32, 128>}, {pipeline_mode = #tpu.pipeline_mode<synchronous>, transform_indices = @transform_2, window_bounds = array<i64: 1, 128>}, {pipeline_mode = #tpu.pipeline_mode<synchronous>, transform_indices = @transform_3, window_bounds = array<i64: 128, 128>}, {pipeline_mode = #tpu.pipeline_mode<synchronous>, transform_indices = @transform_4, window_bounds = array<i64: 1, 128>}, {pipeline_mode = #tpu.pipeline_mode<synchronous>, transform_indices = @transform_5, window_bounds = array<i64: 128, 1>}, {pipeline_mode = #tpu.pipeline_mode<synchronous>, transform_indices = @transform_6, window_bounds = array<i64: 1, 1>}, {transform_indices = @transform_7, window_bounds = array<i64: 128, 1>}]} {
    %c0 = arith.constant 0 : index
    %c0_0 = arith.constant 0 : index
    %0 = vector.load %arg1[%c0, %c0_0] : memref<128x32xf32, #tpu.memory_space<vmem>>, vector<128x32xf32>
    %1 = arith.truncf %0 : vector<128x32xf32> to vector<128x32xbf16>
    %c0_1 = arith.constant 0 : index
    %c0_2 = arith.constant 0 : index
    %2 = vector.load %arg2[%c0_1, %c0_2] : memref<32x128xbf16, #tpu.memory_space<vmem>>, vector<32x128xbf16>
    %cst = arith.constant dense<0.000000e+00> : vector<128x128xf32>
    %3 = tpu.matmul %1, %2, %cst {dimension_numbers = #tpu.dot_dimension_numbers<[1], [0], [0], [1], [0, 0, 1, 1], [], []>} : vector<128x32xbf16>, vector<32x128xbf16>, vector<128x128xf32> -> vector<128x128xf32>
    %c0_3 = arith.constant 0 : index
    %c0_4 = arith.constant 0 : index
    %4 = vector.load %arg3[%c0_3, %c0_4] : memref<1x128xf32, #tpu.memory_space<vmem>>, vector<1x128xf32>
    %5 = vector.broadcast %4 : vector<1x128xf32> to vector<128x128xf32>
    %6 = arith.addf %3, %5 : vector<128x128xf32>
    %cst_5 = arith.constant 0.000000e+00 : f32
    %7 = vector.broadcast %cst_5 : f32 to vector<128x128xf32>
    %8 = arith.maximumf %6, %7 : vector<128x128xf32>
    %9 = arith.truncf %8 : vector<128x128xf32> to vector<128x128xbf16>
    %c0_6 = arith.constant 0 : index
    %c0_7 = arith.constant 0 : index
    %10 = vector.load %arg4[%c0_6, %c0_7] : memref<128x128xbf16, #tpu.memory_space<vmem>>, vector<128x128xbf16>
    %cst_8 = arith.constant dense<0.000000e+00> : vector<128x128xf32>
    %11 = tpu.matmul %9, %10, %cst_8 {dimension_numbers = #tpu.dot_dimension_numbers<[1], [0], [0], [1], [0, 0, 1, 1], [], []>} : vector<128x128xbf16>, vector<128x128xbf16>, vector<128x128xf32> -> vector<128x128xf32>
    %c0_9 = arith.constant 0 : index
    %c0_10 = arith.constant 0 : index
    %12 = vector.load %arg5[%c0_9, %c0_10] : memref<1x128xf32, #tpu.memory_space<vmem>>, vector<1x128xf32>
    %13 = vector.broadcast %12 : vector<1x128xf32> to vector<128x128xf32>
    %14 = arith.addf %11, %13 : vector<128x128xf32>
    %cst_11 = arith.constant 0.000000e+00 : f32
    %15 = vector.broadcast %cst_11 : f32 to vector<128x128xf32>
    %16 = arith.maximumf %14, %15 : vector<128x128xf32>
    %17 = arith.truncf %16 : vector<128x128xf32> to vector<128x128xbf16>
    %c0_12 = arith.constant 0 : index
    %c0_13 = arith.constant 0 : index
    %18 = vector.load %arg6[%c0_12, %c0_13] : memref<128x1xbf16, #tpu.memory_space<vmem>>, vector<128x1xbf16>
    %cst_14 = arith.constant dense<0.000000e+00> : vector<128x1xf32>
    %19 = tpu.matmul %17, %18, %cst_14 {dimension_numbers = #tpu.dot_dimension_numbers<[1], [0], [0], [1], [0, 0, 1, 1], [], []>} : vector<128x128xbf16>, vector<128x1xbf16>, vector<128x1xf32> -> vector<128x1xf32>
    %c0_15 = arith.constant 0 : index
    %c0_16 = arith.constant 0 : index
    %20 = vector.load %arg7[%c0_15, %c0_16] : memref<1x1xf32, #tpu.memory_space<vmem>>, vector<1x1xf32>
    %21 = vector.broadcast %20 : vector<1x1xf32> to vector<128x1xf32>
    %22 = arith.addf %19, %21 : vector<128x1xf32>
    %c0_17 = arith.constant 0 : index
    %c0_18 = arith.constant 0 : index
    %23 = vector.load %arg8[%c0_17, %c0_18] : memref<128x1xf32, #tpu.memory_space<vmem>>, vector<128x1xf32>
    tpu.vector_store %arg8[%c0_17, %c0_18], %22 {strides = array<i32>} : memref<128x1xf32, #tpu.memory_space<vmem>>, vector<128x1xf32>,
    return
  }
  func.func @transform_0(%arg0: i32) -> (i32, i32) {
    %c0_i32 = arith.constant 0 : i32
    %c0_i32_0 = arith.constant 0 : i32
    return %arg0, %c0_i32 : i32, i32
  }
  func.func @transform_1(%arg0: i32) -> (i32, i32) {
    %c0_i32 = arith.constant 0 : i32
    %c0_i32_0 = arith.constant 0 : i32
    %c0_i32_1 = arith.constant 0 : i32
    return %c0_i32, %c0_i32_0 : i32, i32
  }
  func.func @transform_2(%arg0: i32) -> (i32, i32) {
    %c0_i32 = arith.constant 0 : i32
    %c0_i32_0 = arith.constant 0 : i32
    %c0_i32_1 = arith.constant 0 : i32
    return %c0_i32, %c0_i32_0 : i32, i32
  }
  func.func @transform_3(%arg0: i32) -> (i32, i32) {
    %c0_i32 = arith.constant 0 : i32
    %c0_i32_0 = arith.constant 0 : i32
    %c0_i32_1 = arith.constant 0 : i32
    return %c0_i32, %c0_i32_0 : i32, i32
  }
  func.func @transform_4(%arg0: i32) -> (i32, i32) {
    %c0_i32 = arith.constant 0 : i32
    %c0_i32_0 = arith.constant 0 : i32
    %c0_i32_1 = arith.constant 0 : i32
    return %c0_i32, %c0_i32_0 : i32, i32
  }
  func.func @transform_5(%arg0: i32) -> (i32, i32) {
    %c0_i32 = arith.constant 0 : i32
    %c0_i32_0 = arith.constant 0 : i32
    %c0_i32_1 = arith.constant 0 : i32
    return %c0_i32, %c0_i32_0 : i32, i32
  }
  func.func @transform_6(%arg0: i32) -> (i32, i32) {
    %c0_i32 = arith.constant 0 : i32
    %c0_i32_0 = arith.constant 0 : i32
    %c0_i32_1 = arith.constant 0 : i32
    return %c0_i32, %c0_i32_0 : i32, i32
  }
  func.func @transform_7(%arg0: i32) -> (i32, i32) {
    %c0_i32 = arith.constant 0 : i32
    %c0_i32_0 = arith.constant 0 : i32
    return %arg0, %c0_i32 : i32, i32
  }
}

module attributes {stable_mosaic.version = 11 : i64} {
  func.func @mlp_kernel(%arg0: i32, %arg1: memref<128x32xf32, #tpu.memory_space<vmem>>, %arg2: memref<32x128xbf16, #tpu.memory_space<vmem>>, %arg3: memref<1x128xf32, #tpu.memory_space<vmem>>, %arg4: memref<128x128xbf16, #tpu.memory_space<vmem>>, %arg5: memref<1x128xf32, #tpu.memory_space<vmem>>, %arg6: memref<128x1xbf16, #tpu.memory_space<vmem>>, %arg7: memref<1x1xf32, #tpu.memory_space<vmem>>, %arg8: memref<128x1xf32, #tpu.memory_space<vmem>>) attributes {dimension_semantics = [#tpu.dimension_semantics<parallel>], iteration_bounds = array<i64: 1>, scalar_prefetch = 0 : i64, scratch_operands = 0 : i64, tpu.core_type = #tpu.core_type<tc>, window_params = [{transform_indices = @transform_0, window_bounds = array<i64: 128, 32>}, {pipeline_mode = #tpu.pipeline_mode<synchronous>, transform_indices = @transform_1, window_bounds = array<i64: 32, 128>}, {pipeline_mode = #tpu.pipeline_mode<synchronous>, transform_indices = @transform_2, window_bounds = array<i64: 1, 128>}, {pipeline_mode = #tpu.pipeline_mode<synchronous>, transform_indices = @transform_3, window_bounds = array<i64: 128, 128>}, {pipeline_mode = #tpu.pipeline_mode<synchronous>, transform_indices = @transform_4, window_bounds = array<i64: 1, 128>}, {pipeline_mode = #tpu.pipeline_mode<synchronous>, transform_indices = @transform_5, window_bounds = array<i64: 128, 1>}, {pipeline_mode = #tpu.pipeline_mode<synchronous>, transform_indices = @transform_6, window_bounds = array<i64: 1, 1>}, {transform_indices = @transform_7, window_bounds = array<i64: 128, 1>}]} {
    %c0 = arith.constant 0 : index
    %c0_0 = arith.constant 0 : index
    %0 = vector.load %arg1[%c0, %c0_0] : memref<128x32xf32, #tpu.memory_space<vmem>>, vector<128x32xf32>
    %1 = arith.truncf %0 : vector<128x32xf32> to vector<128x32xbf16>
    %c0_1 = arith.constant 0 : index
    %c0_2 = arith.constant 0 : index
    %2 = vector.load %arg2[%c0_1, %c0_2] : memref<32x128xbf16, #tpu.memory_space<vmem>>, vector<32x128xbf16>
    %cst = arith.constant dense<0.000000e+00> : vector<128x128xf32>
    %3 = tpu.matmul %1, %2, %cst {dimension_numbers = #tpu.dot_dimension_numbers<[1], [0], [0], [1], [0, 0, 1, 1], [], []>} : vector<128x32xbf16>, vector<32x128xbf16>, vector<128x128xf32> -> vector<128x128xf32>
    %c0_3 = arith.constant 0 : index
    %c0_4 = arith.constant 0 : index
    %4 = vector.load %arg3[%c0_3, %c0_4] : memref<1x128xf32, #tpu.memory_space<vmem>>, vector<1x128xf32>
    %5 = vector.broadcast %4 : vector<1x128xf32> to vector<128x128xf32>
    %6 = arith.addf %3, %5 : vector<128x128xf32>
    %cst_5 = arith.constant 0.000000e+00 : f32
    %7 = vector.broadcast %cst_5 : f32 to vector<128x128xf32>
    %8 = arith.maximumf %6, %7 : vector<128x128xf32>
    %9 = arith.truncf %8 : vector<128x128xf32> to vector<128x128xbf16>
    %c0_6 = arith.constant 0 : index
    %c0_7 = arith.constant 0 : index
    %10 = vector.load %arg4[%c0_6, %c0_7] : memref<128x128xbf16, #tpu.memory_space<vmem>>, vector<128x128xbf16>
    %cst_8 = arith.constant dense<0.000000e+00> : vector<128x128xf32>
    %11 = tpu.matmul %9, %10, %cst_8 {dimension_numbers = #tpu.dot_dimension_numbers<[1], [0], [0], [1], [0, 0, 1, 1], [], []>} : vector<128x128xbf16>, vector<128x128xbf16>, vector<128x128xf32> -> vector<128x128xf32>
    %c0_9 = arith.constant 0 : index
    %c0_10 = arith.constant 0 : index
    %12 = vector.load %arg5[%c0_9, %c0_10] : memref<1x128xf32, #tpu.memory_space<vmem>>, vector<1x128xf32>
    %13 = vector.broadcast %12 : vector<1x128xf32> to vector<128x128xf32>
    %14 = arith.addf %11, %13 : vector<128x128xf32>
    %cst_11 = arith.constant 0.000000e+00 : f32
    %15 = vector.broadcast %cst_11 : f32 to vector<128x128xf32>
    %16 = arith.maximumf %14, %15 : vector<128x128xf32>
    %17 = arith.truncf %16 : vector<128x128xf32> to vector<128x128xbf16>
    %c0_12 = arith.constant 0 : index
    %c0_13 = arith.constant 0 : index
    %18 = vector.load %arg6[%c0_12, %c0_13] : memref<128x1xbf16, #tpu.memory_space<vmem>>, vector<128x1xbf16>
    %cst_14 = arith.constant dense<0.000000e+00> : vector<128x1xf32>
    %19 = tpu.matmul %17, %18, %cst_14 {dimension_numbers = #tpu.dot_dimension_numbers<[1], [0], [0], [1], [0, 0, 1, 1], [], []>} : vector<128x128xbf16>, vector<128x1xbf16>, vector<128x1xf32> -> vector<128x1xf32>
    %c0_15 = arith.constant 0 : index
    %c0_16 = arith.constant 0 : index
    %20 = vector.load %arg7[%c0_15, %c0_16] : memref<1x1xf32, #tpu.memory_space<vmem>>, vector<1x1xf32>
    %21 = vector.broadcast %20 : vector<1x1xf32> to vector<128x1xf32>
    %22 = arith.addf %19, %21 : vector<128x1xf32>
    %c0_17 = arith.constant 0 : index
    %c0_18 = arith.constant 0 : index
    %23 = vector.load %arg8[%c0_17, %c0_18] : memref<128x1xf32, #tpu.memory_space<vmem>>, vector<128x1xf32>
    tpu.vector_store %arg8[%c0_17, %c0_18], %22 {strides = array<i32>} : memref<128x1xf32, #tpu.memory_space<vmem>>, vector<128x1xf32>,
    return
  }
  func.func @transform_0(%arg0: i32) -> (i32, i32) {
    %c0_i32 = arith.constant 0 : i32
    %c0_i32_0 = arith.constant 0 : i32
    return %arg0, %c0_i32 : i32, i32
  }
  func.func @transform_1(%arg0: i32) -> (i32, i32) {
    %c0_i32 = arith.constant 0 : i32
    %c0_i32_0 = arith.constant 0 : i32
    %c0_i32_1 = arith.constant 0 : i32
    return %c0_i32, %c0_i32_0 : i32, i32
  }
  func.func @transform_2(%arg0: i32) -> (i32, i32) {
    %c0_i32 = arith.constant 0 : i32
    %c0_i32_0 = arith.constant 0 : i32
    %c0_i32_1 = arith.constant 0 : i32
    return %c0_i32, %c0_i32_0 : i32, i32
  }
  func.func @transform_3(%arg0: i32) -> (i32, i32) {
    %c0_i32 = arith.constant 0 : i32
    %c0_i32_0 = arith.constant 0 : i32
    %c0_i32_1 = arith.constant 0 : i32
    return %c0_i32, %c0_i32_0 : i32, i32
  }
  func.func @transform_4(%arg0: i32) -> (i32, i32) {
    %c0_i32 = arith.constant 0 : i32
    %c0_i32_0 = arith.constant 0 : i32
    %c0_i32_1 = arith.constant 0 : i32
    return %c0_i32, %c0_i32_0 : i32, i32
  }
  func.func @transform_5(%arg0: i32) -> (i32, i32) {
    %c0_i32 = arith.constant 0 : i32
    %c0_i32_0 = arith.constant 0 : i32
    %c0_i32_1 = arith.constant 0 : i32
    return %c0_i32, %c0_i32_0 : i32, i32
  }
  func.func @transform_6(%arg0: i32) -> (i32, i32) {
    %c0_i32 = arith.constant 0 : i32
    %c0_i32_0 = arith.constant 0 : i32
    %c0_i32_1 = arith.constant 0 : i32
    return %c0_i32, %c0_i32_0 : i32, i32
  }
  func.func @transform_7(%arg0: i32) -> (i32, i32) {
    %c0_i32 = arith.constant 0 : i32
    %c0_i32_0 = arith.constant 0 : i32
    return %arg0, %c0_i32 : i32, i32
  }
}

</mosaic_0001>

<bundles_post_ra>
// kernel: tpu_custom_call.1
= control target key start
LH: loop header
LB: loop body
LE: loop exit
PB: predicated region body
PF: predicated region fallthrough
CT: control target
= control target key end

     0   :  { %vm76_vm0 = vcmask 261120   ;;  %vm582_vm1 = vcmask 7168   ;;  %s999_s1 = inlined_call_operand.vmem [shape: bf16[32,128], index: 1, kind: input, shape index: {}]   ;;  %s1000_s0 = inlined_call_operand.vmem [shape: f32[128,32], index: 0, kind: input, shape index: {}]   ;;  %s1001_s3 = inlined_call_operand.vmem [shape: bf16[128,128], index: 3, kind: input, shape index: {}]   ;;  %s1002_s5 = inlined_call_operand.vmem [shape: bf16[128,1], index: 5, kind: input, shape index: {}]   ;;  %s1003_s2 = inlined_call_operand.vmem [shape: f32[1,128], index: 2, kind: input, shape index: {}]   ;;  %s1004_s6 = inlined_call_operand.<no memory space> [shape: f32[1,1], index: 6, kind: input, shape index: {}]   ;;  %s1005_s4 = inlined_call_operand.vmem [shape: f32[1,128], index: 4, kind: input, shape index: {}]   ;;  %s1006_s7 = inlined_call_operand.vmem [shape: f32[128,1], index: 7, kind: output, shape index: {}]  }
   0x1   :  { %v758_v0 = vld [vmem:[%s999_s1 + $0x8] sm:$0xff]   ;;  %v759_v1 = vld [vmem:[%s999_s1] sm:$0xff]   ;;  %v31_v5 = vld [vmem:[%s1000_s0 + $0x10] sm:$0xff] }
   0x2   :  { %674 = vmatprep.subr.bf16.mxu0 %v758_v0  ;;  %v29_v2 = vld [vmem:[%s1000_s0] sm:$0xff]  ;;  %v30_v3 = vld [vmem:[%s1000_s0 + $0x8] sm:$0xff]  ;;  %v32_v6 = vld [vmem:[%s1000_s0 + $0x18] sm:$0xff] }
   0x3   :  { %675 = vmatpush3.bf16.msra.mxu0 %v758_v0  ;;  %v45_v4 = vpack.c.bf16 %v30_v3, %v29_v2  ;;  %v33_v7 = vld [vmem:[%s1000_s0 + $0x20] sm:$0xff]  ;;  %v34_v8 = vld [vmem:[%s1000_s0 + $0x28] sm:$0xff]  ;;  %v46_v9 = vpack.c.bf16 %v32_v6, %v31_v5  ;;  %v760_v11 = vld [vmem:[%s1001_s3 + $0x38] sm:$0xff]  }
   0x4   :  { %676 = vmatprep.subr.bf16.mxu0 %v759_v1  ;;  %v47_v10 = vpack.c.bf16 %v34_v8, %v33_v7  ;;  %v35_v12 = vld [vmem:[%s1000_s0 + $0x30] sm:$0xff]  ;;  %v36_v13 = vld [vmem:[%s1000_s0 + $0x38] sm:$0xff]  ;;  %v37_v15 = vld [vmem:[%s1000_s0 + $0x40] sm:$0xff]  ;;  %694 = vmatprep.subr.bf16.mxu1 %v760_v11 }
   0x5   :  { %678 = vmatprep.mubr.msk.bf16.mxu0 %vm76_vm0, %v45_v4  ;;  %v761_v14 = vld [vmem:[%s1001_s3 + $0x30] sm:$0xff]   ;;  %v38_v16 = vld [vmem:[%s1000_s0 + $0x48] sm:$0xff]  ;;  %695 = vmatpush3.bf16.msra.mxu1 %v760_v11  ;;  %v48_v18 = vpack.c.bf16 %v36_v13, %v35_v12  ;;  %v763_v20 = vld [vmem:[%s1001_s3 + $0x20] sm:$0xff]  }
   0x6   :  { %696 = vmatprep.subr.bf16.mxu1 %v761_v14  ;;  %v762_v17 = vld [vmem:[%s1001_s3 + $0x28] sm:$0xff]   ;;  %v49_v19 = vpack.c.bf16 %v38_v16, %v37_v15  ;;  %v39_v21 = vld [vmem:[%s1000_s0 + $0x50] sm:$0xff]  ;;  %v40_v22 = vld [vmem:[%s1000_s0 + $0x58] sm:$0xff] }
   0x7   :  { %677 = vmatpush3.bf16.msra.mxu0 %v759_v1  ;;  %v41_v23 = vld [vmem:[%s1000_s0 + $0x60] sm:$0xff]  ;;  %v42_v24 = vld [vmem:[%s1000_s0 + $0x68] sm:$0xff]  ;;  %v764_v25 = vld [vmem:[%s1001_s3 + $0x18] sm:$0xff]   ;;  %v50_v26 = vpack.c.bf16 %v40_v22, %v39_v21 }
   0x8   :  { %v51_v27 = vpack.c.bf16 %v42_v24, %v41_v23  ;;  %v43_v28 = vld [vmem:[%s1000_s0 + $0x70] sm:$0xff]  ;;  %v44_v29 = vld [vmem:[%s1000_s0 + $0x78] sm:$0xff]  ;;  %v766_v32 = vld [vmem:[%s1001_s3 + $0x8] sm:$0xff]  }
   0x9   :  { %697 = vmatpush3.bf16.msra.mxu1 %v761_v14  ;;  %v52_v30 = vpack.c.bf16 %v44_v29, %v43_v28  ;;  %v765_v31 = vld [vmem:[%s1001_s3 + $0x10] sm:$0xff]   ;;  %v767_v33 = vld [vmem:[%s1001_s3] sm:$0xff]   ;;  %v768_v34 = vld [vmem:[%s1002_s5 + $0x38] sm:$0xff]  }
   0xa   :  { %679 = vmatmul.mubr.msk.bf16.vlgmr.msra.gmra.mxu0 %vm76_vm0, %v46_v9  ;;  %698 = vmatprep.subr.bf16.mxu1 %v762_v17  ;;  %v769_v35 = vld [vmem:[%s1002_s5 + $0x30] sm:$0xff]   ;;  %v770_v36 = vld [vmem:[%s1002_s5 + $0x28] sm:$0xff]   ;;  %v771_v37 = vld [vmem:[%s1002_s5 + $0x20] sm:$0xff]  }
   0xb   :  { %682 = vmatprep.mubr.msk.bf16.mxu0 %vm76_vm0, %v47_v10  ;;  %726 = vmatprep.subr.bf16.mxu0 %v768_v34  ;;  %v772_v38 = vld [vmem:[%s1002_s5 + $0x18] sm:$0xff]   ;;  %v603_v41 = vld [vmem:[%s1003_s2] ss:$0 sm:$0xff] }
   0xc   :  { %727 = vmatpush3.bf16.msra.mxu0 %v768_v34  ;;  %v775_v34 = vld [vmem:[%s1002_s5] sm:$0xff]  }
   0xd   :  { %699 = vmatpush3.bf16.msra.mxu1 %v762_v17  ;;  %728 = vmatprep.subr.bf16.mxu0 %v769_v35 }
   0xe   :  { %700 = vmatprep.subr.bf16.mxu1 %v763_v20 }
  0x10   :  { %729 = vmatpush3.bf16.msra.mxu0 %v769_v35  ;;  %v12_v35 = vstv %s1004_s6 }
  0x11   :  { %701 = vmatpush3.bf16.msra.mxu1 %v763_v20  ;;  %730 = vmatprep.subr.bf16.mxu0 %v770_v36  ;;  %13 = vst [vmem:[#allocation2] sm:$0x1] %v12_v35 }
  0x12   :  { %683 = vmatmul.mubr.msk.bf16.gmra.mxu0 %vm76_vm0, %v48_v18  ;;  %702 = vmatprep.subr.bf16.mxu1 %v764_v25 }
  0x13   :  { %686 = vmatprep.mubr.msk.bf16.mxu0 %vm76_vm0, %v49_v19 }
  0x14   :  { %731 = vmatpush3.bf16.msra.mxu0 %v770_v36 }
  0x15   :  { %703 = vmatpush3.bf16.msra.mxu1 %v764_v25  ;;  %732 = vmatprep.subr.bf16.mxu0 %v771_v37 }
  0x16   :  { %704 = vmatprep.subr.bf16.mxu1 %v765_v31 }
  0x18   :  { %733 = vmatpush3.bf16.msra.mxu0 %v771_v37 }
  0x19   :  { %705 = vmatpush3.bf16.msra.mxu1 %v765_v31  ;;  %734 = vmatprep.subr.bf16.mxu0 %v772_v38 }
  0x1a   :  { %687 = vmatmul.mubr.msk.bf16.gmra.mxu0 %vm76_vm0, %v50_v26  ;;  %706 = vmatprep.subr.bf16.mxu1 %v766_v32 }
  0x1b   :  { %690 = vmatprep.mubr.msk.bf16.mxu0 %vm76_vm0, %v51_v27 }
  0x1c   :  { %735 = vmatpush3.bf16.msra.mxu0 %v772_v38  ;;  %v614_v38 = vld [vmem:[%s1005_s4] ss:$0 sm:$0xff] }
  0x1d   :  { %707 = vmatpush3.bf16.msra.mxu1 %v766_v32  ;;  %v773_v32 = vld [vmem:[%s1002_s5 + $0x10] sm:$0xff]  }
  0x1e   :  { %708 = vmatprep.subr.bf16.mxu1 %v767_v33  ;;  %736 = vmatprep.subr.bf16.mxu0 %v773_v32 }
  0x20   :  { %737 = vmatpush3.bf16.msra.mxu0 %v773_v32 }
  0x21   :  { %709 = vmatpush3.bf16.msra.mxu1 %v767_v33  ;;  %v774_v33 = vld [vmem:[%s1002_s5 + $0x8] sm:$0xff]  }
  0x22   :  { %691 = vmatmul.mubr.msk.bf16.gmra.mxu0 %vm76_vm0, %v52_v30  ;;  %738 = vmatprep.subr.bf16.mxu0 %v774_v33 }
  0x24   :  { %739 = vmatpush3.bf16.msra.mxu0 %v774_v33 }
  0x25   :  { %740 = vmatprep.subr.bf16.mxu0 %v775_v34 }
  0x28   :  { %741 = vmatpush3.bf16.msra.mxu0 %v775_v34 }
  0xca   :  { %v680_v39 = vpop.f32.mrf.mxu0 }
  0xcb   :  { %v144_v45 = vadd.f32 %v680_v39, %v603_v41 }
  0xcc   :  { %v135_v40 = vpop.f32.mrf.mxu0 }
  0xcd   :  { %v136_v43 = vadd.f32 %v603_v41, %v135_v40  ;;  %v200_v52 = vmax.f32 %v144_v45, 0.0 }
  0xce   :  { %v681_v42 = vpop.f32.mrf.mxu0 }
  0xcf   :  { %v147_v44 = vadd.f32 %v681_v42, %v603_v41  ;;  %v198_v50 = vmax.f32 %v136_v43, 0.0 }
  0xd0   :  { %v138_v46 = vpop.f32.mrf.mxu0 }
  0xd1   :  { %v139_v47 = vadd.f32 %v603_v41, %v138_v46  ;;  %v201_v48 = vmax.f32 %v147_v44, 0.0 }
  0xd2   :  { %v684_v49 = vpop.f32.mrf.mxu0 }
  0xd3   :  { %v199_v51 = vmax.f32 %v139_v47, 0.0  ;;  %v215_v55 = vpack.c.bf16 %v201_v48, %v200_v52  ;;  %v160_v59 = vadd.f32 %v684_v49, %v603_v41 }
  0xd4   :  { %v151_v53 = vpop.f32.mrf.mxu0 }
  0xd5   :  { %v214_v54 = vpack.c.bf16 %v199_v51, %v198_v50  ;;  %v152_v57 = vadd.f32 %v603_v41, %v151_v53  ;;  %v204_v2 = vmax.f32 %v160_v59, 0.0 }
  0xd6   :  { %v685_v56 = vpop.f32.mrf.mxu0 }
  0xd7   :  { %v163_v58 = vadd.f32 %v685_v56, %v603_v41  ;;  %710 = vmatprep.mubr.bf16.mxu1 %v214_v54  ;;  %v202_v0 = vmax.f32 %v152_v57, 0.0 }
  0xd8   :  { %v154_v60 = vpop.f32.mrf.mxu0  ;;  %711 = vmatmul.mubr.bf16.vlgmr.msra.gmra.mxu1 %v215_v55 }
  0xd9   :  { %v155_v61 = vadd.f32 %v603_v41, %v154_v60  ;;  %v205_v62 = vmax.f32 %v163_v58, 0.0 }
  0xda   :  { %v688_v63 = vpop.f32.mrf.mxu0 }
  0xdb   :  { %v203_v1 = vmax.f32 %v155_v61, 0.0  ;;  %v217_v5 = vpack.c.bf16 %v205_v62, %v204_v2  ;;  %v176_v9 = vadd.f32 %v688_v63, %v603_v41 }
  0xdc   :  { %v167_v3 = vpop.f32.mrf.mxu0 }
  0xdd   :  { %v216_v4 = vpack.c.bf16 %v203_v1, %v202_v0  ;;  %v168_v7 = vadd.f32 %v603_v41, %v167_v3  ;;  %v208_v16 = vmax.f32 %v176_v9, 0.0 }
  0xde   :  { %v689_v6 = vpop.f32.mrf.mxu0 }
  0xdf   :  { %v179_v8 = vadd.f32 %v689_v6, %v603_v41  ;;  %714 = vmatprep.mubr.bf16.mxu1 %v216_v4  ;;  %v206_v14 = vmax.f32 %v168_v7, 0.0 }
  0xe0   :  { %v170_v10 = vpop.f32.mrf.mxu0  ;;  %715 = vmatmul.mubr.bf16.gmra.mxu1 %v217_v5 }
  0xe1   :  { %v171_v11 = vadd.f32 %v603_v41, %v170_v10  ;;  %v209_v12 = vmax.f32 %v179_v8, 0.0 }
  0xe2   :  { %v692_v13 = vpop.f32.mrf.mxu0 }
  0xe3   :  { %v207_v15 = vmax.f32 %v171_v11, 0.0  ;;  %v219_v19 = vpack.c.bf16 %v209_v12, %v208_v16  ;;  %v192_v23 = vadd.f32 %v692_v13, %v603_v41 }
  0xe4   :  { %v183_v17 = vpop.f32.mrf.mxu0 }
  0xe5   :  { %v218_v18 = vpack.c.bf16 %v207_v15, %v206_v14  ;;  %v184_v21 = vadd.f32 %v603_v41, %v183_v17  ;;  %v212_v29 = vmax.f32 %v192_v23, 0.0 }
  0xe6   :  { %v693_v20 = vpop.f32.mrf.mxu0 }
  0xe7   :  { %v195_v22 = vadd.f32 %v693_v20, %v603_v41  ;;  %718 = vmatprep.mubr.bf16.mxu1 %v218_v18  ;;  %v210_v27 = vmax.f32 %v184_v21, 0.0 }
  0xe8   :  { %v186_v24 = vpop.f32.mrf.mxu0  ;;  %719 = vmatmul.mubr.bf16.gmra.mxu1 %v219_v19 }
  0xe9   :  { %v187_v25 = vadd.f32 %v603_v41, %v186_v24  ;;  %v213_v26 = vmax.f32 %v195_v22, 0.0 }
  0xeb   :  { %v211_v28 = vmax.f32 %v187_v25, 0.0  ;;  %v221_v31 = vpack.c.bf16 %v213_v26, %v212_v29  ;;  %v623_v29 = vld [vmem:[#allocation2] ss:$0 sm:$0xff] }
  0xed   :  { %v220_v30 = vpack.c.bf16 %v211_v28, %v210_v27 }
  0xef   :  { %722 = vmatprep.mubr.bf16.mxu1 %v220_v30 }
  0xf0   :  { %723 = vmatmul.mubr.bf16.gmra.mxu1 %v221_v31 }
 0x198   :  { %v712_v36 = vpop.f32.mrf.mxu1 }
 0x199   :  { %v336_v42 = vadd.f32 %v712_v36, %v614_v38 }
 0x19a   :  { %v327_v37 = vpop.f32.mrf.mxu1 }
 0x19b   :  { %v328_v40 = vadd.f32 %v614_v38, %v327_v37  ;;  %v392_v49 = vmax.f32 %v336_v42, 0.0 }
 0x19c   :  { %v713_v39 = vpop.f32.mrf.mxu1 }
 0x19d   :  { %v339_v41 = vadd.f32 %v713_v39, %v614_v38  ;;  %v390_v47 = vmax.f32 %v328_v40, 0.0 }
 0x19e   :  { %v330_v43 = vpop.f32.mrf.mxu1 }
 0x19f   :  { %v331_v44 = vadd.f32 %v614_v38, %v330_v43  ;;  %v393_v45 = vmax.f32 %v339_v41, 0.0 }
 0x1a0   :  { %v716_v46 = vpop.f32.mrf.mxu1 }
 0x1a1   :  { %v391_v48 = vmax.f32 %v331_v44, 0.0  ;;  %v407_v52 = vpack.c.bf16 %v393_v45, %v392_v49  ;;  %v352_v56 = vadd.f32 %v716_v46, %v614_v38 }
 0x1a2   :  { %v343_v50 = vpop.f32.mrf.mxu1 }
 0x1a3   :  { %v406_v51 = vpack.c.bf16 %v391_v48, %v390_v47  ;;  %v344_v54 = vadd.f32 %v614_v38, %v343_v50  ;;  %v396_v63 = vmax.f32 %v352_v56, 0.0 }
 0x1a4   :  { %v717_v53 = vpop.f32.mrf.mxu1 }
 0x1a5   :  { %v355_v55 = vadd.f32 %v717_v53, %v614_v38  ;;  %742 = vmatprep.mubr.bf16.mxu0 %v406_v51  ;;  %v394_v61 = vmax.f32 %v344_v54, 0.0 }
 0x1a6   :  { %v346_v57 = vpop.f32.mrf.mxu1  ;;  %743 = vmatmul.mubr.bf16.vlgmr.msra.gmra.mxu0 %v407_v52 }
 0x1a7   :  { %v347_v58 = vadd.f32 %v614_v38, %v346_v57  ;;  %v397_v59 = vmax.f32 %v355_v55, 0.0 }
 0x1a8   :  { %v720_v60 = vpop.f32.mrf.mxu1 }
 0x1a9   :  { %v395_v62 = vmax.f32 %v347_v58, 0.0  ;;  %v409_v2 = vpack.c.bf16 %v397_v59, %v396_v63  ;;  %v368_v6 = vadd.f32 %v720_v60, %v614_v38 }
 0x1aa   :  { %v359_v0 = vpop.f32.mrf.mxu1 }
 0x1ab   :  { %v408_v1 = vpack.c.bf16 %v395_v62, %v394_v61  ;;  %v360_v4 = vadd.f32 %v614_v38, %v359_v0  ;;  %v400_v13 = vmax.f32 %v368_v6, 0.0 }
 0x1ac   :  { %v721_v3 = vpop.f32.mrf.mxu1 }
 0x1ad   :  { %v371_v5 = vadd.f32 %v721_v3, %v614_v38  ;;  %746 = vmatprep.mubr.bf16.mxu0 %v408_v1  ;;  %v398_v11 = vmax.f32 %v360_v4, 0.0 }
 0x1ae   :  { %v362_v7 = vpop.f32.mrf.mxu1  ;;  %747 = vmatmul.mubr.bf16.gmra.mxu0 %v409_v2 }
 0x1af   :  { %v363_v8 = vadd.f32 %v614_v38, %v362_v7  ;;  %v401_v9 = vmax.f32 %v371_v5, 0.0 }
 0x1b0   :  { %v724_v10 = vpop.f32.mrf.mxu1 }
 0x1b1   :  { %v399_v12 = vmax.f32 %v363_v8, 0.0  ;;  %v411_v16 = vpack.c.bf16 %v401_v9, %v400_v13  ;;  %v384_v20 = vadd.f32 %v724_v10, %v614_v38 }
 0x1b2   :  { %v375_v14 = vpop.f32.mrf.mxu1 }
 0x1b3   :  { %v410_v15 = vpack.c.bf16 %v399_v12, %v398_v11  ;;  %v376_v18 = vadd.f32 %v614_v38, %v375_v14  ;;  %v404_v26 = vmax.f32 %v384_v20, 0.0 }
 0x1b4   :  { %v725_v17 = vpop.f32.mrf.mxu1 }
 0x1b5   :  { %v387_v19 = vadd.f32 %v725_v17, %v614_v38  ;;  %750 = vmatprep.mubr.bf16.mxu0 %v410_v15  ;;  %v402_v24 = vmax.f32 %v376_v18, 0.0 }
 0x1b6   :  { %v378_v21 = vpop.f32.mrf.mxu1  ;;  %751 = vmatmul.mubr.bf16.gmra.mxu0 %v411_v16 }
 0x1b7   :  { %v379_v22 = vadd.f32 %v614_v38, %v378_v21  ;;  %v405_v23 = vmax.f32 %v387_v19, 0.0 }
 0x1b9   :  { %v403_v25 = vmax.f32 %v379_v22, 0.0  ;;  %v413_v28 = vpack.c.bf16 %v405_v23, %v404_v26 }
 0x1bb   :  { %v412_v27 = vpack.c.bf16 %v403_v25, %v402_v24 }
 0x1bd   :  { %754 = vmatprep.mubr.bf16.mxu0 %v412_v27 }
 0x1be   :  { %755 = vmatmul.mubr.bf16.gmra.mxu0 %v413_v28 }
 0x266   :  { %v744_v30 = vpop.f32.mrf.mxu0 }
 0x267   :  { %v528_v31 = vadd.f32 %v744_v30, %v623_v29 }
 0x268   :  { %v519_v32 = vpop.f32.mrf.mxu0 }
 0x269   :  { %585 = vst.msk [vmem:[%s1006_s7 + $0x10] sm:$0xff] %vm582_vm1, %v528_v31  ;;  %v520_v33 = vadd.f32 %v623_v29, %v519_v32 }
 0x26a   :  { %v745_v34 = vpop.f32.mrf.mxu0 }
 0x26b   :  { %583 = vst.msk [vmem:[%s1006_s7] sm:$0xff] %vm582_vm1, %v520_v33  ;;  %v531_v35 = vadd.f32 %v745_v34, %v623_v29 }
 0x26c   :  { %v522_v36 = vpop.f32.mrf.mxu0 }
 0x26d   :  { %586 = vst.msk [vmem:[%s1006_s7 + $0x18] sm:$0xff] %vm582_vm1, %v531_v35  ;;  %v523_v37 = vadd.f32 %v623_v29, %v522_v36 }
 0x26e   :  { %v748_v38 = vpop.f32.mrf.mxu0 }
 0x26f   :  { %584 = vst.msk [vmem:[%s1006_s7 + $0x8] sm:$0xff] %vm582_vm1, %v523_v37  ;;  %v544_v39 = vadd.f32 %v748_v38, %v623_v29 }
 0x270   :  { %v535_v40 = vpop.f32.mrf.mxu0 }
 0x271   :  { %589 = vst.msk [vmem:[%s1006_s7 + $0x30] sm:$0xff] %vm582_vm1, %v544_v39  ;;  %v536_v41 = vadd.f32 %v623_v29, %v535_v40 }
 0x272   :  { %v749_v42 = vpop.f32.mrf.mxu0 }
 0x273   :  { %587 = vst.msk [vmem:[%s1006_s7 + $0x20] sm:$0xff] %vm582_vm1, %v536_v41  ;;  %v547_v43 = vadd.f32 %v749_v42, %v623_v29 }
 0x274   :  { %v538_v44 = vpop.f32.mrf.mxu0 }
 0x275   :  { %590 = vst.msk [vmem:[%s1006_s7 + $0x38] sm:$0xff] %vm582_vm1, %v547_v43  ;;  %v539_v45 = vadd.f32 %v623_v29, %v538_v44 }
 0x276   :  { %v752_v46 = vpop.f32.mrf.mxu0 }
 0x277   :  { %588 = vst.msk [vmem:[%s1006_s7 + $0x28] sm:$0xff] %vm582_vm1, %v539_v45  ;;  %v560_v47 = vadd.f32 %v752_v46, %v623_v29 }
 0x278   :  { %v551_v48 = vpop.f32.mrf.mxu0 }
 0x279   :  { %593 = vst.msk [vmem:[%s1006_s7 + $0x50] sm:$0xff] %vm582_vm1, %v560_v47  ;;  %v552_v49 = vadd.f32 %v623_v29, %v551_v48 }
 0x27a   :  { %v753_v50 = vpop.f32.mrf.mxu0 }
 0x27b   :  { %591 = vst.msk [vmem:[%s1006_s7 + $0x40] sm:$0xff] %vm582_vm1, %v552_v49  ;;  %v563_v51 = vadd.f32 %v753_v50, %v623_v29 }
 0x27c   :  { %v554_v52 = vpop.f32.mrf.mxu0 }
 0x27d   :  { %594 = vst.msk [vmem:[%s1006_s7 + $0x58] sm:$0xff] %vm582_vm1, %v563_v51  ;;  %v555_v53 = vadd.f32 %v623_v29, %v554_v52 }
 0x27e   :  { %v756_v54 = vpop.f32.mrf.mxu0 }
 0x27f   :  { %592 = vst.msk [vmem:[%s1006_s7 + $0x48] sm:$0xff] %vm582_vm1, %v555_v53  ;;  %v576_v55 = vadd.f32 %v756_v54, %v623_v29 }
 0x280   :  { %v567_v56 = vpop.f32.mrf.mxu0 }
 0x281   :  { %597 = vst.msk [vmem:[%s1006_s7 + $0x70] sm:$0xff] %vm582_vm1, %v576_v55  ;;  %v568_v57 = vadd.f32 %v623_v29, %v567_v56 }
 0x282   :  { %v757_v58 = vpop.f32.mrf.mxu0 }
 0x283   :  { %595 = vst.msk [vmem:[%s1006_s7 + $0x60] sm:$0xff] %vm582_vm1, %v568_v57  ;;  %v579_v59 = vadd.f32 %v757_v58, %v623_v29 }
 0x284   :  { %v570_v60 = vpop.f32.mrf.mxu0 }
 0x285   :  { %598 = vst.msk [vmem:[%s1006_s7 + $0x78] sm:$0xff] %vm582_vm1, %v579_v59  ;;  %v571_v61 = vadd.f32 %v623_v29, %v570_v60 }
 0x287   :  { %596 = vst.msk [vmem:[%s1006_s7 + $0x68] sm:$0xff] %vm582_vm1, %v571_v61 }

// kernel: tpu_custom_call.1
= control target key start
LH: loop header
LB: loop body
LE: loop exit
PB: predicated region body
PF: predicated region fallthrough
CT: control target
= control target key end

     0   :  { %vm76_vm0 = vcmask 261120   ;;  %vm582_vm1 = vcmask 7168   ;;  %s999_s1 = inlined_call_operand.vmem [shape: bf16[32,128], index: 1, kind: input, shape index: {}]   ;;  %s1000_s0 = inlined_call_operand.vmem [shape: f32[128,32], index: 0, kind: input, shape index: {}]   ;;  %s1001_s3 = inlined_call_operand.vmem [shape: bf16[128,128], index: 3, kind: input, shape index: {}]   ;;  %s1002_s5 = inlined_call_operand.vmem [shape: bf16[128,1], index: 5, kind: input, shape index: {}]   ;;  %s1003_s2 = inlined_call_operand.vmem [shape: f32[1,128], index: 2, kind: input, shape index: {}]   ;;  %s1004_s6 = inlined_call_operand.<no memory space> [shape: f32[1,1], index: 6, kind: input, shape index: {}]   ;;  %s1005_s4 = inlined_call_operand.vmem [shape: f32[1,128], index: 4, kind: input, shape index: {}]   ;;  %s1006_s7 = inlined_call_operand.vmem [shape: f32[128,1], index: 7, kind: output, shape index: {}]  }
   0x1   :  { %v758_v0 = vld [vmem:[%s999_s1 + $0x8] sm:$0xff]   ;;  %v759_v1 = vld [vmem:[%s999_s1] sm:$0xff]   ;;  %v31_v5 = vld [vmem:[%s1000_s0 + $0x10] sm:$0xff] }
   0x2   :  { %674 = vmatprep.subr.bf16.mxu0 %v758_v0  ;;  %v29_v2 = vld [vmem:[%s1000_s0] sm:$0xff]  ;;  %v30_v3 = vld [vmem:[%s1000_s0 + $0x8] sm:$0xff]  ;;  %v32_v6 = vld [vmem:[%s1000_s0 + $0x18] sm:$0xff] }
   0x3   :  { %675 = vmatpush3.bf16.msra.mxu0 %v758_v0  ;;  %v45_v4 = vpack.c.bf16 %v30_v3, %v29_v2  ;;  %v33_v7 = vld [vmem:[%s1000_s0 + $0x20] sm:$0xff]  ;;  %v34_v8 = vld [vmem:[%s1000_s0 + $0x28] sm:$0xff]  ;;  %v46_v9 = vpack.c.bf16 %v32_v6, %v31_v5  ;;  %v760_v11 = vld [vmem:[%s1001_s3 + $0x38] sm:$0xff]  }
   0x4   :  { %676 = vmatprep.subr.bf16.mxu0 %v759_v1  ;;  %v47_v10 = vpack.c.bf16 %v34_v8, %v33_v7  ;;  %v35_v12 = vld [vmem:[%s1000_s0 + $0x30] sm:$0xff]  ;;  %v36_v13 = vld [vmem:[%s1000_s0 + $0x38] sm:$0xff]  ;;  %v37_v15 = vld [vmem:[%s1000_s0 + $0x40] sm:$0xff]  ;;  %694 = vmatprep.subr.bf16.mxu1 %v760_v11 }
   0x5   :  { %678 = vmatprep.mubr.msk.bf16.mxu0 %vm76_vm0, %v45_v4  ;;  %v761_v14 = vld [vmem:[%s1001_s3 + $0x30] sm:$0xff]   ;;  %v38_v16 = vld [vmem:[%s1000_s0 + $0x48] sm:$0xff]  ;;  %695 = vmatpush3.bf16.msra.mxu1 %v760_v11  ;;  %v48_v18 = vpack.c.bf16 %v36_v13, %v35_v12  ;;  %v763_v20 = vld [vmem:[%s1001_s3 + $0x20] sm:$0xff]  }
   0x6   :  { %696 = vmatprep.subr.bf16.mxu1 %v761_v14  ;;  %v762_v17 = vld [vmem:[%s1001_s3 + $0x28] sm:$0xff]   ;;  %v49_v19 = vpack.c.bf16 %v38_v16, %v37_v15  ;;  %v39_v21 = vld [vmem:[%s1000_s0 + $0x50] sm:$0xff]  ;;  %v40_v22 = vld [vmem:[%s1000_s0 + $0x58] sm:$0xff] }
   0x7   :  { %677 = vmatpush3.bf16.msra.mxu0 %v759_v1  ;;  %v41_v23 = vld [vmem:[%s1000_s0 + $0x60] sm:$0xff]  ;;  %v42_v24 = vld [vmem:[%s1000_s0 + $0x68] sm:$0xff]  ;;  %v764_v25 = vld [vmem:[%s1001_s3 + $0x18] sm:$0xff]   ;;  %v50_v26 = vpack.c.bf16 %v40_v22, %v39_v21 }
   0x8   :  { %v51_v27 = vpack.c.bf16 %v42_v24, %v41_v23  ;;  %v43_v28 = vld [vmem:[%s1000_s0 + $0x70] sm:$0xff]  ;;  %v44_v29 = vld [vmem:[%s1000_s0 + $0x78] sm:$0xff]  ;;  %v766_v32 = vld [vmem:[%s1001_s3 + $0x8] sm:$0xff]  }
   0x9   :  { %697 = vmatpush3.bf16.msra.mxu1 %v761_v14  ;;  %v52_v30 = vpack.c.bf16 %v44_v29, %v43_v28  ;;  %v765_v31 = vld [vmem:[%s1001_s3 + $0x10] sm:$0xff]   ;;  %v767_v33 = vld [vmem:[%s1001_s3] sm:$0xff]   ;;  %v768_v34 = vld [vmem:[%s1002_s5 + $0x38] sm:$0xff]  }
   0xa   :  { %679 = vmatmul.mubr.msk.bf16.vlgmr.msra.gmra.mxu0 %vm76_vm0, %v46_v9  ;;  %698 = vmatprep.subr.bf16.mxu1 %v762_v17  ;;  %v769_v35 = vld [vmem:[%s1002_s5 + $0x30] sm:$0xff]   ;;  %v770_v36 = vld [vmem:[%s1002_s5 + $0x28] sm:$0xff]   ;;  %v771_v37 = vld [vmem:[%s1002_s5 + $0x20] sm:$0xff]  }
   0xb   :  { %682 = vmatprep.mubr.msk.bf16.mxu0 %vm76_vm0, %v47_v10  ;;  %726 = vmatprep.subr.bf16.mxu0 %v768_v34  ;;  %v772_v38 = vld [vmem:[%s1002_s5 + $0x18] sm:$0xff]   ;;  %v603_v41 = vld [vmem:[%s1003_s2] ss:$0 sm:$0xff] }
   0xc   :  { %727 = vmatpush3.bf16.msra.mxu0 %v768_v34  ;;  %v775_v34 = vld [vmem:[%s1002_s5] sm:$0xff]  }
   0xd   :  { %699 = vmatpush3.bf16.msra.mxu1 %v762_v17  ;;  %728 = vmatprep.subr.bf16.mxu0 %v769_v35 }
   0xe   :  { %700 = vmatprep.subr.bf16.mxu1 %v763_v20 }
  0x10   :  { %729 = vmatpush3.bf16.msra.mxu0 %v769_v35  ;;  %v12_v35 = vstv %s1004_s6 }
  0x11   :  { %701 = vmatpush3.bf16.msra.mxu1 %v763_v20  ;;  %730 = vmatprep.subr.bf16.mxu0 %v770_v36  ;;  %13 = vst [vmem:[#allocation2] sm:$0x1] %v12_v35 }
  0x12   :  { %683 = vmatmul.mubr.msk.bf16.gmra.mxu0 %vm76_vm0, %v48_v18  ;;  %702 = vmatprep.subr.bf16.mxu1 %v764_v25 }
  0x13   :  { %686 = vmatprep.mubr.msk.bf16.mxu0 %vm76_vm0, %v49_v19 }
  0x14   :  { %731 = vmatpush3.bf16.msra.mxu0 %v770_v36 }
  0x15   :  { %703 = vmatpush3.bf16.msra.mxu1 %v764_v25  ;;  %732 = vmatprep.subr.bf16.mxu0 %v771_v37 }
  0x16   :  { %704 = vmatprep.subr.bf16.mxu1 %v765_v31 }
  0x18   :  { %733 = vmatpush3.bf16.msra.mxu0 %v771_v37 }
  0x19   :  { %705 = vmatpush3.bf16.msra.mxu1 %v765_v31  ;;  %734 = vmatprep.subr.bf16.mxu0 %v772_v38 }
  0x1a   :  { %687 = vmatmul.mubr.msk.bf16.gmra.mxu0 %vm76_vm0, %v50_v26  ;;  %706 = vmatprep.subr.bf16.mxu1 %v766_v32 }
  0x1b   :  { %690 = vmatprep.mubr.msk.bf16.mxu0 %vm76_vm0, %v51_v27 }
  0x1c   :  { %735 = vmatpush3.bf16.msra.mxu0 %v772_v38  ;;  %v614_v38 = vld [vmem:[%s1005_s4] ss:$0 sm:$0xff] }
  0x1d   :  { %707 = vmatpush3.bf16.msra.mxu1 %v766_v32  ;;  %v773_v32 = vld [vmem:[%s1002_s5 + $0x10] sm:$0xff]  }
  0x1e   :  { %708 = vmatprep.subr.bf16.mxu1 %v767_v33  ;;  %736 = vmatprep.subr.bf16.mxu0 %v773_v32 }
  0x20   :  { %737 = vmatpush3.bf16.msra.mxu0 %v773_v32 }
  0x21   :  { %709 = vmatpush3.bf16.msra.mxu1 %v767_v33  ;;  %v774_v33 = vld [vmem:[%s1002_s5 + $0x8] sm:$0xff]  }
  0x22   :  { %691 = vmatmul.mubr.msk.bf16.gmra.mxu0 %vm76_vm0, %v52_v30  ;;  %738 = vmatprep.subr.bf16.mxu0 %v774_v33 }
  0x24   :  { %739 = vmatpush3.bf16.msra.mxu0 %v774_v33 }
  0x25   :  { %740 = vmatprep.subr.bf16.mxu0 %v775_v34 }
  0x28   :  { %741 = vmatpush3.bf16.msra.mxu0 %v775_v34 }
  0xca   :  { %v680_v39 = vpop.f32.mrf.mxu0 }
  0xcb   :  { %v144_v45 = vadd.f32 %v680_v39, %v603_v41 }
  0xcc   :  { %v135_v40 = vpop.f32.mrf.mxu0 }
  0xcd   :  { %v136_v43 = vadd.f32 %v603_v41, %v135_v40  ;;  %v200_v52 = vmax.f32 %v144_v45, 0.0 }
  0xce   :  { %v681_v42 = vpop.f32.mrf.mxu0 }
  0xcf   :  { %v147_v44 = vadd.f32 %v681_v42, %v603_v41  ;;  %v198_v50 = vmax.f32 %v136_v43, 0.0 }
  0xd0   :  { %v138_v46 = vpop.f32.mrf.mxu0 }
  0xd1   :  { %v139_v47 = vadd.f32 %v603_v41, %v138_v46  ;;  %v201_v48 = vmax.f32 %v147_v44, 0.0 }
  0xd2   :  { %v684_v49 = vpop.f32.mrf.mxu0 }
  0xd3   :  { %v199_v51 = vmax.f32 %v139_v47, 0.0  ;;  %v215_v55 = vpack.c.bf16 %v201_v48, %v200_v52  ;;  %v160_v59 = vadd.f32 %v684_v49, %v603_v41 }
  0xd4   :  { %v151_v53 = vpop.f32.mrf.mxu0 }
  0xd5   :  { %v214_v54 = vpack.c.bf16 %v199_v51, %v198_v50  ;;  %v152_v57 = vadd.f32 %v603_v41, %v151_v53  ;;  %v204_v2 = vmax.f32 %v160_v59, 0.0 }
  0xd6   :  { %v685_v56 = vpop.f32.mrf.mxu0 }
  0xd7   :  { %v163_v58 = vadd.f32 %v685_v56, %v603_v41  ;;  %710 = vmatprep.mubr.bf16.mxu1 %v214_v54  ;;  %v202_v0 = vmax.f32 %v152_v57, 0.0 }
  0xd8   :  { %v154_v60 = vpop.f32.mrf.mxu0  ;;  %711 = vmatmul.mubr.bf16.vlgmr.msra.gmra.mxu1 %v215_v55 }
  0xd9   :  { %v155_v61 = vadd.f32 %v603_v41, %v154_v60  ;;  %v205_v62 = vmax.f32 %v163_v58, 0.0 }
  0xda   :  { %v688_v63 = vpop.f32.mrf.mxu0 }
  0xdb   :  { %v203_v1 = vmax.f32 %v155_v61, 0.0  ;;  %v217_v5 = vpack.c.bf16 %v205_v62, %v204_v2  ;;  %v176_v9 = vadd.f32 %v688_v63, %v603_v41 }
  0xdc   :  { %v167_v3 = vpop.f32.mrf.mxu0 }
  0xdd   :  { %v216_v4 = vpack.c.bf16 %v203_v1, %v202_v0  ;;  %v168_v7 = vadd.f32 %v603_v41, %v167_v3  ;;  %v208_v16 = vmax.f32 %v176_v9, 0.0 }
  0xde   :  { %v689_v6 = vpop.f32.mrf.mxu0 }
  0xdf   :  { %v179_v8 = vadd.f32 %v689_v6, %v603_v41  ;;  %714 = vmatprep.mubr.bf16.mxu1 %v216_v4  ;;  %v206_v14 = vmax.f32 %v168_v7, 0.0 }
  0xe0   :  { %v170_v10 = vpop.f32.mrf.mxu0  ;;  %715 = vmatmul.mubr.bf16.gmra.mxu1 %v217_v5 }
  0xe1   :  { %v171_v11 = vadd.f32 %v603_v41, %v170_v10  ;;  %v209_v12 = vmax.f32 %v179_v8, 0.0 }
  0xe2   :  { %v692_v13 = vpop.f32.mrf.mxu0 }
  0xe3   :  { %v207_v15 = vmax.f32 %v171_v11, 0.0  ;;  %v219_v19 = vpack.c.bf16 %v209_v12, %v208_v16  ;;  %v192_v23 = vadd.f32 %v692_v13, %v603_v41 }
  0xe4   :  { %v183_v17 = vpop.f32.mrf.mxu0 }
  0xe5   :  { %v218_v18 = vpack.c.bf16 %v207_v15, %v206_v14  ;;  %v184_v21 = vadd.f32 %v603_v41, %v183_v17  ;;  %v212_v29 = vmax.f32 %v192_v23, 0.0 }
  0xe6   :  { %v693_v20 = vpop.f32.mrf.mxu0 }
  0xe7   :  { %v195_v22 = vadd.f32 %v693_v20, %v603_v41  ;;  %718 = vmatprep.mubr.bf16.mxu1 %v218_v18  ;;  %v210_v27 = vmax.f32 %v184_v21, 0.0 }
  0xe8   :  { %v186_v24 = vpop.f32.mrf.mxu0  ;;  %719 = vmatmul.mubr.bf16.gmra.mxu1 %v219_v19 }
  0xe9   :  { %v187_v25 = vadd.f32 %v603_v41, %v186_v24  ;;  %v213_v26 = vmax.f32 %v195_v22, 0.0 }
  0xeb   :  { %v211_v28 = vmax.f32 %v187_v25, 0.0  ;;  %v221_v31 = vpack.c.bf16 %v213_v26, %v212_v29  ;;  %v623_v29 = vld [vmem:[#allocation2] ss:$0 sm:$0xff] }
  0xed   :  { %v220_v30 = vpack.c.bf16 %v211_v28, %v210_v27 }
  0xef   :  { %722 = vmatprep.mubr.bf16.mxu1 %v220_v30 }
  0xf0   :  { %723 = vmatmul.mubr.bf16.gmra.mxu1 %v221_v31 }
 0x198   :  { %v712_v36 = vpop.f32.mrf.mxu1 }
 0x199   :  { %v336_v42 = vadd.f32 %v712_v36, %v614_v38 }
 0x19a   :  { %v327_v37 = vpop.f32.mrf.mxu1 }
 0x19b   :  { %v328_v40 = vadd.f32 %v614_v38, %v327_v37  ;;  %v392_v49 = vmax.f32 %v336_v42, 0.0 }
 0x19c   :  { %v713_v39 = vpop.f32.mrf.mxu1 }
 0x19d   :  { %v339_v41 = vadd.f32 %v713_v39, %v614_v38  ;;  %v390_v47 = vmax.f32 %v328_v40, 0.0 }
 0x19e   :  { %v330_v43 = vpop.f32.mrf.mxu1 }
 0x19f   :  { %v331_v44 = vadd.f32 %v614_v38, %v330_v43  ;;  %v393_v45 = vmax.f32 %v339_v41, 0.0 }
 0x1a0   :  { %v716_v46 = vpop.f32.mrf.mxu1 }
 0x1a1   :  { %v391_v48 = vmax.f32 %v331_v44, 0.0  ;;  %v407_v52 = vpack.c.bf16 %v393_v45, %v392_v49  ;;  %v352_v56 = vadd.f32 %v716_v46, %v614_v38 }
 0x1a2   :  { %v343_v50 = vpop.f32.mrf.mxu1 }
 0x1a3   :  { %v406_v51 = vpack.c.bf16 %v391_v48, %v390_v47  ;;  %v344_v54 = vadd.f32 %v614_v38, %v343_v50  ;;  %v396_v63 = vmax.f32 %v352_v56, 0.0 }
 0x1a4   :  { %v717_v53 = vpop.f32.mrf.mxu1 }
 0x1a5   :  { %v355_v55 = vadd.f32 %v717_v53, %v614_v38  ;;  %742 = vmatprep.mubr.bf16.mxu0 %v406_v51  ;;  %v394_v61 = vmax.f32 %v344_v54, 0.0 }
 0x1a6   :  { %v346_v57 = vpop.f32.mrf.mxu1  ;;  %743 = vmatmul.mubr.bf16.vlgmr.msra.gmra.mxu0 %v407_v52 }
 0x1a7   :  { %v347_v58 = vadd.f32 %v614_v38, %v346_v57  ;;  %v397_v59 = vmax.f32 %v355_v55, 0.0 }
 0x1a8   :  { %v720_v60 = vpop.f32.mrf.mxu1 }
 0x1a9   :  { %v395_v62 = vmax.f32 %v347_v58, 0.0  ;;  %v409_v2 = vpack.c.bf16 %v397_v59, %v396_v63  ;;  %v368_v6 = vadd.f32 %v720_v60, %v614_v38 }
 0x1aa   :  { %v359_v0 = vpop.f32.mrf.mxu1 }
 0x1ab   :  { %v408_v1 = vpack.c.bf16 %v395_v62, %v394_v61  ;;  %v360_v4 = vadd.f32 %v614_v38, %v359_v0  ;;  %v400_v13 = vmax.f32 %v368_v6, 0.0 }
 0x1ac   :  { %v721_v3 = vpop.f32.mrf.mxu1 }
 0x1ad   :  { %v371_v5 = vadd.f32 %v721_v3, %v614_v38  ;;  %746 = vmatprep.mubr.bf16.mxu0 %v408_v1  ;;  %v398_v11 = vmax.f32 %v360_v4, 0.0 }
 0x1ae   :  { %v362_v7 = vpop.f32.mrf.mxu1  ;;  %747 = vmatmul.mubr.bf16.gmra.mxu0 %v409_v2 }
 0x1af   :  { %v363_v8 = vadd.f32 %v614_v38, %v362_v7  ;;  %v401_v9 = vmax.f32 %v371_v5, 0.0 }
 0x1b0   :  { %v724_v10 = vpop.f32.mrf.mxu1 }
 0x1b1   :  { %v399_v12 = vmax.f32 %v363_v8, 0.0  ;;  %v411_v16 = vpack.c.bf16 %v401_v9, %v400_v13  ;;  %v384_v20 = vadd.f32 %v724_v10, %v614_v38 }
 0x1b2   :  { %v375_v14 = vpop.f32.mrf.mxu1 }
 0x1b3   :  { %v410_v15 = vpack.c.bf16 %v399_v12, %v398_v11  ;;  %v376_v18 = vadd.f32 %v614_v38, %v375_v14  ;;  %v404_v26 = vmax.f32 %v384_v20, 0.0 }
 0x1b4   :  { %v725_v17 = vpop.f32.mrf.mxu1 }
 0x1b5   :  { %v387_v19 = vadd.f32 %v725_v17, %v614_v38  ;;  %750 = vmatprep.mubr.bf16.mxu0 %v410_v15  ;;  %v402_v24 = vmax.f32 %v376_v18, 0.0 }
 0x1b6   :  { %v378_v21 = vpop.f32.mrf.mxu1  ;;  %751 = vmatmul.mubr.bf16.gmra.mxu0 %v411_v16 }
 0x1b7   :  { %v379_v22 = vadd.f32 %v614_v38, %v378_v21  ;;  %v405_v23 = vmax.f32 %v387_v19, 0.0 }
 0x1b9   :  { %v403_v25 = vmax.f32 %v379_v22, 0.0  ;;  %v413_v28 = vpack.c.bf16 %v405_v23, %v404_v26 }
 0x1bb   :  { %v412_v27 = vpack.c.bf16 %v403_v25, %v402_v24 }
 0x1bd   :  { %754 = vmatprep.mubr.bf16.mxu0 %v412_v27 }
 0x1be   :  { %755 = vmatmul.mubr.bf16.gmra.mxu0 %v413_v28 }
 0x266   :  { %v744_v30 = vpop.f32.mrf.mxu0 }
 0x267   :  { %v528_v31 = vadd.f32 %v744_v30, %v623_v29 }
 0x268   :  { %v519_v32 = vpop.f32.mrf.mxu0 }
 0x269   :  { %585 = vst.msk [vmem:[%s1006_s7 + $0x10] sm:$0xff] %vm582_vm1, %v528_v31  ;;  %v520_v33 = vadd.f32 %v623_v29, %v519_v32 }
 0x26a   :  { %v745_v34 = vpop.f32.mrf.mxu0 }
 0x26b   :  { %583 = vst.msk [vmem:[%s1006_s7] sm:$0xff] %vm582_vm1, %v520_v33  ;;  %v531_v35 = vadd.f32 %v745_v34, %v623_v29 }
 0x26c   :  { %v522_v36 = vpop.f32.mrf.mxu0 }
 0x26d   :  { %586 = vst.msk [vmem:[%s1006_s7 + $0x18] sm:$0xff] %vm582_vm1, %v531_v35  ;;  %v523_v37 = vadd.f32 %v623_v29, %v522_v36 }
 0x26e   :  { %v748_v38 = vpop.f32.mrf.mxu0 }
 0x26f   :  { %584 = vst.msk [vmem:[%s1006_s7 + $0x8] sm:$0xff] %vm582_vm1, %v523_v37  ;;  %v544_v39 = vadd.f32 %v748_v38, %v623_v29 }
 0x270   :  { %v535_v40 = vpop.f32.mrf.mxu0 }
 0x271   :  { %589 = vst.msk [vmem:[%s1006_s7 + $0x30] sm:$0xff] %vm582_vm1, %v544_v39  ;;  %v536_v41 = vadd.f32 %v623_v29, %v535_v40 }
 0x272   :  { %v749_v42 = vpop.f32.mrf.mxu0 }
 0x273   :  { %587 = vst.msk [vmem:[%s1006_s7 + $0x20] sm:$0xff] %vm582_vm1, %v536_v41  ;;  %v547_v43 = vadd.f32 %v749_v42, %v623_v29 }
 0x274   :  { %v538_v44 = vpop.f32.mrf.mxu0 }
 0x275   :  { %590 = vst.msk [vmem:[%s1006_s7 + $0x38] sm:$0xff] %vm582_vm1, %v547_v43  ;;  %v539_v45 = vadd.f32 %v623_v29, %v538_v44 }
 0x276   :  { %v752_v46 = vpop.f32.mrf.mxu0 }
 0x277   :  { %588 = vst.msk [vmem:[%s1006_s7 + $0x28] sm:$0xff] %vm582_vm1, %v539_v45  ;;  %v560_v47 = vadd.f32 %v752_v46, %v623_v29 }
 0x278   :  { %v551_v48 = vpop.f32.mrf.mxu0 }
 0x279   :  { %593 = vst.msk [vmem:[%s1006_s7 + $0x50] sm:$0xff] %vm582_vm1, %v560_v47  ;;  %v552_v49 = vadd.f32 %v623_v29, %v551_v48 }
 0x27a   :  { %v753_v50 = vpop.f32.mrf.mxu0 }
 0x27b   :  { %591 = vst.msk [vmem:[%s1006_s7 + $0x40] sm:$0xff] %vm582_vm1, %v552_v49  ;;  %v563_v51 = vadd.f32 %v753_v50, %v623_v29 }
 0x27c   :  { %v554_v52 = vpop.f32.mrf.mxu0 }
 0x27d   :  { %594 = vst.msk [vmem:[%s1006_s7 + $0x58] sm:$0xff] %vm582_vm1, %v563_v51  ;;  %v555_v53 = vadd.f32 %v623_v29, %v554_v52 }
 0x27e   :  { %v756_v54 = vpop.f32.mrf.mxu0 }
 0x27f   :  { %592 = vst.msk [vmem:[%s1006_s7 + $0x48] sm:$0xff] %vm582_vm1, %v555_v53  ;;  %v576_v55 = vadd.f32 %v756_v54, %v623_v29 }
 0x280   :  { %v567_v56 = vpop.f32.mrf.mxu0 }
 0x281   :  { %597 = vst.msk [vmem:[%s1006_s7 + $0x70] sm:$0xff] %vm582_vm1, %v576_v55  ;;  %v568_v57 = vadd.f32 %v623_v29, %v567_v56 }
 0x282   :  { %v757_v58 = vpop.f32.mrf.mxu0 }
 0x283   :  { %595 = vst.msk [vmem:[%s1006_s7 + $0x60] sm:$0xff] %vm582_vm1, %v568_v57  ;;  %v579_v59 = vadd.f32 %v757_v58, %v623_v29 }
 0x284   :  { %v570_v60 = vpop.f32.mrf.mxu0 }
 0x285   :  { %598 = vst.msk [vmem:[%s1006_s7 + $0x78] sm:$0xff] %vm582_vm1, %v579_v59  ;;  %v571_v61 = vadd.f32 %v623_v29, %v570_v60 }
 0x287   :  { %596 = vst.msk [vmem:[%s1006_s7 + $0x68] sm:$0xff] %vm582_vm1, %v571_v61 }

</bundles_post_ra>
